<compile_context>
chip_gen: v7x
topology: tpu7x:2x2x1
jax: 0.10.0
libtpu: 0.0.40
codegen_flags: <defaults>
</compile_context>

<pallas_src>
import functools

import jax
import jax.numpy as jnp
from jax import lax
from jax.experimental import pallas as pl
from jax.experimental.pallas import tpu as pltpu


KSIZE = 7   # Conv1d kernel size
PAD = 3     # Conv1d padding ("same" for stride 1)


# ----------------------------- Pallas kernel ---------------------------------
def _spatial_attention_kernel(x_ref, w_ref, o_ref, sum_ref, max_ref, *, inv_c):
    # x_ref  : (tb, tc, L) VMEM block of the input
    # w_ref  : (2*KSIZE,)  f32 SMEM  (flattened Conv1d weight: [avg taps | max taps])
    # o_ref  : (tb, L)     VMEM output block (resident across the C axis)
    # sum_ref/max_ref : (tb, L) f32 VMEM scratch, persist across grid steps
    c_idx = pl.program_id(1)
    c_num = pl.num_programs(1)

    @pl.when(c_idx == 0)
    def _():
        sum_ref[...] = jnp.zeros_like(sum_ref)
        max_ref[...] = jnp.full_like(max_ref, -jnp.inf)

    # Accumulate the channel reduction in f32 (important if x is bf16,
    # especially on v5e which has no bf16 VALU).
    x = x_ref[...].astype(jnp.float32)                    # (tb, tc, L)
    sum_ref[...] += jnp.sum(x, axis=1)
    max_ref[...] = jnp.maximum(max_ref[...], jnp.max(x, axis=1))

    @pl.when(c_idx == c_num - 1)
    def _():
        avg = sum_ref[...] * inv_c                        # (tb, L)
        mx = max_ref[...]
        tb, L = avg.shape

        # 7-tap "same" conv over L:
        #   out[b, l] = sum_k avg[b, l+k-3]*w[k] + max[b, l+k-3]*w[7+k]
        # avg/max are combined with their scalar tap weights BEFORE rolling
        # (roll is linear): 6 XLU rolls total, center tap needs no roll/mask.
        # Each non-center tap uses a single-sided boundary mask (only one side
        # of the row can run out of bounds for a given shift direction).
        lane = lax.broadcasted_iota(jnp.int32, (tb, L), 1)
        acc = avg * w_ref[PAD] + mx * w_ref[KSIZE + PAD]  # d == 0 tap
        for k in range(KSIZE):
            d = k - PAD
            if d == 0:
                continue
            comb = avg * w_ref[k] + mx * w_ref[KSIZE + k]
            comb = pltpu.roll(comb, shift=(-d) % L, axis=1)
            valid = (lane <= (L - 1) - d) if d > 0 else (lane >= -d)
            acc = acc + jnp.where(valid, comb, 0.0)

        o_ref[...] = jax.nn.sigmoid(acc)


# ------------------------------ wrapper ---------------------------------------
def spatial_attention(x, w, *, block_bytes=4 << 20):
    """x: (B, C, L) (same NCL layout as PyTorch); w: (2, KSIZE) float32
    (the Conv1d(2, 1, 7).weight[0]).  Returns (B, 1, L) float32."""
    B, C, L = x.shape
    w_flat = w.reshape(2 * KSIZE).astype(jnp.float32)     # 1-D -> 64 B of SMEM

    # Batch tile: second-minor dim of the output block must be a multiple of 8
    # or the full batch.  Multiple B blocks let v7x's two TCs split the work.
    tb = 8 if (B > 8 and B % 8 == 0) else B

    # Channel tile: stream the reduction; each (tb, tc, L) block is kept around
    # `block_bytes` (~4 MiB) so the double-buffered input fits comfortably in
    # the smallest scoped-VMEM default (v5e 16 MiB, v7x 32 MiB).  tc must be a
    # multiple of 8 (or the full C) and must divide C exactly so the running
    # max never sees padded garbage.
    tc = C
    if tb * C * L * 4 > block_bytes:
        max_tc = max(8, block_bytes // (tb * L * 4))
        max_tc -= max_tc % 8
        tc = next((t for t in range(max_tc, 7, -8) if C % t == 0), C)

    grid = (B // tb, C // tc)
    kernel = functools.partial(_spatial_attention_kernel, inv_c=1.0 / C)

    cost = pl.CostEstimate(
        flops=B * L * (2 * C + 4 * KSIZE),
        transcendentals=B * L,
        bytes_accessed=4 * (B * C * L + B * L + 2 * KSIZE),
    )

    out = pl.pallas_call(
        kernel,
        out_shape=jax.ShapeDtypeStruct((B, L), jnp.float32),
        grid=grid,
        in_specs=[
            pl.BlockSpec((tb, tc, L), lambda i, k: (i, k, 0)),
            pl.BlockSpec(memory_space=pltpu.MemorySpace.SMEM),   # whole (14,) weight
        ],
        # Same output block across the C (reduction) axis -> stays resident,
        # written once at the final reduction step; L kept whole so the store
        # is lane-dense (unmasked vst).
        out_specs=pl.BlockSpec((tb, L), lambda i, k: (i, 0)),
        scratch_shapes=[
            pltpu.VMEM((tb, L), jnp.float32),   # running channel sum
            pltpu.VMEM((tb, L), jnp.float32),   # running channel max
        ],
        compiler_params=pltpu.CompilerParams(
            dimension_semantics=("parallel", "arbitrary")),
        cost_estimate=cost,
    )(x, w_flat)
    return out.reshape(B, 1, L)


# ------------------------------ pure-JAX reference ---------------------------
def spatial_attention_reference(x, w):
    avg = jnp.mean(x, axis=1, keepdims=True)
    mx = jnp.max(x, axis=1, keepdims=True)
    feat = jnp.concatenate([avg, mx], axis=1)             # (B, 2, L)
    out = lax.conv_general_dilated(
        feat, w.reshape(1, 2, KSIZE),
        window_strides=(1,), padding=((PAD, PAD),),
        dimension_numbers=("NCH", "OIH", "NCH"))
    return jax.nn.sigmoid(out)                            # (B, 1, L)


# ----------------------------------- main -------------------------------------
if __name__ == "__main__":
    B, C, L = 2, 16, 128   # small validation shape; L=128 keeps stores lane-dense

    key = jax.random.PRNGKey(0)
    kx, kw = jax.random.split(key)
    x = jax.random.normal(kx, (B, C, L), jnp.float32)
    w = 0.3 * jax.random.normal(kw, (2, KSIZE), jnp.float32)  # Conv1d(2,1,7).weight[0]

    out = jax.block_until_ready(spatial_attention(x, w))
    ref = jax.block_until_ready(spatial_attention_reference(x, w))

    assert out.shape == (B, 1, L)
    assert jnp.allclose(out, ref, atol=1e-4, rtol=1e-4), "mismatch vs reference"

    print("KERNEL_OK")
</pallas_src>

<mosaic_0001>
module attributes {stable_mosaic.version = 11 : i64} {
  func.func @_spatial_attention_kernel(%arg0: i32, %arg1: i32, %arg2: memref<2x16x128xf32, #tpu.memory_space<vmem>>, %arg3: memref<14xf32, #tpu.memory_space<smem>>, %arg4: memref<2x128xf32, #tpu.memory_space<vmem>>, %arg5: memref<2x128xf32, #tpu.memory_space<vmem>>, %arg6: memref<2x128xf32, #tpu.memory_space<vmem>>) attributes {dimension_semantics = [#tpu.dimension_semantics<parallel>, #tpu.dimension_semantics<arbitrary>], iteration_bounds = array<i64: 1, 1>, scalar_prefetch = 0 : i64, scratch_operands = 2 : i64, tpu.core_type = #tpu.core_type<tc>, window_params = [{transform_indices = @transform_0, window_bounds = array<i64: 2, 16, 128>}, {transform_indices = @transform_1, window_bounds = array<i64: 14>}, {transform_indices = @transform_2, window_bounds = array<i64: 2, 128>}]} {
    %c0_i32 = arith.constant 0 : i32
    %0 = arith.cmpi eq, %arg1, %c0_i32 : i32
    %1 = arith.extui %0 : i1 to i32
    %c0_i32_0 = arith.constant 0 : i32
    %2 = arith.cmpi ne, %1, %c0_i32_0 : i32
    scf.if %2 {
      %cst_14 = arith.constant 0.000000e+00 : f32
      %15 = vector.broadcast %cst_14 : f32 to vector<2x128xf32>
      %c0_15 = arith.constant 0 : index
      %c0_16 = arith.constant 0 : index
      %16 = vector.load %arg5[%c0_15, %c0_16] : memref<2x128xf32, #tpu.memory_space<vmem>>, vector<2x128xf32>
      tpu.vector_store %arg5[%c0_15, %c0_16], %15 {strides = array<i32>} : memref<2x128xf32, #tpu.memory_space<vmem>>, vector<2x128xf32>,
      %cst_17 = arith.constant 0xFF800000 : f32
      %17 = vector.broadcast %cst_17 : f32 to vector<2x128xf32>
      %c0_18 = arith.constant 0 : index
      %c0_19 = arith.constant 0 : index
      %18 = vector.load %arg6[%c0_18, %c0_19] : memref<2x128xf32, #tpu.memory_space<vmem>>, vector<2x128xf32>
      tpu.vector_store %arg6[%c0_18, %c0_19], %17 {strides = array<i32>} : memref<2x128xf32, #tpu.memory_space<vmem>>, vector<2x128xf32>,
    } else {
    }
    %c0 = arith.constant 0 : index
    %c0_1 = arith.constant 0 : index
    %c0_2 = arith.constant 0 : index
    %3 = vector.load %arg2[%c0, %c0_1, %c0_2] : memref<2x16x128xf32, #tpu.memory_space<vmem>>, vector<2x16x128xf32>
    %c0_3 = arith.constant 0 : index
    %c0_4 = arith.constant 0 : index
    %4 = vector.load %arg5[%c0_3, %c0_4] : memref<2x128xf32, #tpu.memory_space<vmem>>, vector<2x128xf32>
    %cst = arith.constant dense<0.000000e+00> : vector<2x128xf32>
    %5 = vector.multi_reduction <add>, %3, %cst [1] : vector<2x16x128xf32> to vector<2x128xf32>
    %6 = arith.addf %4, %5 : vector<2x128xf32>
    %c0_5 = arith.constant 0 : index
    %c0_6 = arith.constant 0 : index
    %7 = vector.load %arg5[%c0_5, %c0_6] : memref<2x128xf32, #tpu.memory_space<vmem>>, vector<2x128xf32>
    tpu.vector_store %arg5[%c0_5, %c0_6], %6 {strides = array<i32>} : memref<2x128xf32, #tpu.memory_space<vmem>>, vector<2x128xf32>,
    %c0_7 = arith.constant 0 : index
    %c0_8 = arith.constant 0 : index
    %8 = vector.load %arg6[%c0_7, %c0_8] : memref<2x128xf32, #tpu.memory_space<vmem>>, vector<2x128xf32>
    %cst_9 = arith.constant dense<0xFF800000> : vector<2x128xf32>
    %9 = vector.multi_reduction <maximumf>, %3, %cst_9 [1] : vector<2x16x128xf32> to vector<2x128xf32>
    %10 = arith.maximumf %8, %9 : vector<2x128xf32>
    %c0_10 = arith.constant 0 : index
    %c0_11 = arith.constant 0 : index
    %11 = vector.load %arg6[%c0_10, %c0_11] : memref<2x128xf32, #tpu.memory_space<vmem>>, vector<2x128xf32>
    tpu.vector_store %arg6[%c0_10, %c0_11], %10 {strides = array<i32>} : memref<2x128xf32, #tpu.memory_space<vmem>>, vector<2x128xf32>,
    %c0_i32_12 = arith.constant 0 : i32
    %12 = arith.cmpi eq, %arg1, %c0_i32_12 : i32
    %13 = arith.extui %12 : i1 to i32
    %c0_i32_13 = arith.constant 0 : i32
    %14 = arith.cmpi ne, %13, %c0_i32_13 : i32
    scf.if %14 {
      %c0_14 = arith.constant 0 : index
      %c0_15 = arith.constant 0 : index
      %15 = vector.load %arg5[%c0_14, %c0_15] : memref<2x128xf32, #tpu.memory_space<vmem>>, vector<2x128xf32>
      %cst_16 = arith.constant 6.250000e-02 : f32
      %16 = vector.broadcast %cst_16 : f32 to vector<2x128xf32>
      %17 = arith.mulf %15, %16 : vector<2x128xf32>
      %c0_17 = arith.constant 0 : index
      %c0_18 = arith.constant 0 : index
      %18 = vector.load %arg6[%c0_17, %c0_18] : memref<2x128xf32, #tpu.memory_space<vmem>>, vector<2x128xf32>
      %19 = tpu.iota {dimensions = array<i32: 1>} : vector<2x128xi32>
      %c3 = arith.constant 3 : index
      %20 = memref.load %arg3[%c3] : memref<14xf32, #tpu.memory_space<smem>>
      %21 = vector.broadcast %20 : f32 to vector<2x128xf32>
      %22 = arith.mulf %17, %21 : vector<2x128xf32>
      %c10 = arith.constant 10 : index
      %23 = memref.load %arg3[%c10] : memref<14xf32, #tpu.memory_space<smem>>
      %24 = vector.broadcast %23 : f32 to vector<2x128xf32>
      %25 = arith.mulf %18, %24 : vector<2x128xf32>
      %26 = arith.addf %22, %25 : vector<2x128xf32>
      %c0_19 = arith.constant 0 : index
      %27 = memref.load %arg3[%c0_19] : memref<14xf32, #tpu.memory_space<smem>>
      %28 = vector.broadcast %27 : f32 to vector<2x128xf32>
      %29 = arith.mulf %17, %28 : vector<2x128xf32>
      %c7 = arith.constant 7 : index
      %30 = memref.load %arg3[%c7] : memref<14xf32, #tpu.memory_space<smem>>
      %31 = vector.broadcast %30 : f32 to vector<2x128xf32>
      %32 = arith.mulf %18, %31 : vector<2x128xf32>
      %33 = arith.addf %29, %32 : vector<2x128xf32>
      %c3_i32 = arith.constant 3 : i32
      %34 = tpu.dynamic_rotate %33 by %c3_i32 dim 1 : vector<2x128xf32>, i32 -> vector<2x128xf32>
      %c3_i32_20 = arith.constant 3 : i32
      %35 = vector.broadcast %c3_i32_20 : i32 to vector<2x128xi32>
      %36 = arith.cmpi sge, %19, %35 : vector<2x128xi32>
      %cst_21 = arith.constant 0.000000e+00 : f32
      %37 = vector.broadcast %cst_21 : f32 to vector<2x128xf32>
      %38 = arith.select %36, %34, %37 : vector<2x128xi1>, vector<2x128xf32>
      %39 = arith.addf %26, %38 : vector<2x128xf32>
      %c1 = arith.constant 1 : index
      %40 = memref.load %arg3[%c1] : memref<14xf32, #tpu.memory_space<smem>>
      %41 = vector.broadcast %40 : f32 to vector<2x128xf32>
      %42 = arith.mulf %17, %41 : vector<2x128xf32>
      %c8 = arith.constant 8 : index
      %43 = memref.load %arg3[%c8] : memref<14xf32, #tpu.memory_space<smem>>
      %44 = vector.broadcast %43 : f32 to vector<2x128xf32>
      %45 = arith.mulf %18, %44 : vector<2x128xf32>
      %46 = arith.addf %42, %45 : vector<2x128xf32>
      %c2_i32 = arith.constant 2 : i32
      %47 = tpu.dynamic_rotate %46 by %c2_i32 dim 1 : vector<2x128xf32>, i32 -> vector<2x128xf32>
      %c2_i32_22 = arith.constant 2 : i32
      %48 = vector.broadcast %c2_i32_22 : i32 to vector<2x128xi32>
      %49 = arith.cmpi sge, %19, %48 : vector<2x128xi32>
      %cst_23 = arith.constant 0.000000e+00 : f32
      %50 = vector.broadcast %cst_23 : f32 to vector<2x128xf32>
      %51 = arith.select %49, %47, %50 : vector<2x128xi1>, vector<2x128xf32>
      %52 = arith.addf %39, %51 : vector<2x128xf32>
      %c2 = arith.constant 2 : index
      %53 = memref.load %arg3[%c2] : memref<14xf32, #tpu.memory_space<smem>>
      %54 = vector.broadcast %53 : f32 to vector<2x128xf32>
      %55 = arith.mulf %17, %54 : vector<2x128xf32>
      %c9 = arith.constant 9 : index
      %56 = memref.load %arg3[%c9] : memref<14xf32, #tpu.memory_space<smem>>
      %57 = vector.broadcast %56 : f32 to vector<2x128xf32>
      %58 = arith.mulf %18, %57 : vector<2x128xf32>
      %59 = arith.addf %55, %58 : vector<2x128xf32>
      %c1_i32 = arith.constant 1 : i32
      %60 = tpu.dynamic_rotate %59 by %c1_i32 dim 1 : vector<2x128xf32>, i32 -> vector<2x128xf32>
      %c1_i32_24 = arith.constant 1 : i32
      %61 = vector.broadcast %c1_i32_24 : i32 to vector<2x128xi32>
      %62 = arith.cmpi sge, %19, %61 : vector<2x128xi32>
      %cst_25 = arith.constant 0.000000e+00 : f32
      %63 = vector.broadcast %cst_25 : f32 to vector<2x128xf32>
      %64 = arith.select %62, %60, %63 : vector<2x128xi1>, vector<2x128xf32>
      %65 = arith.addf %52, %64 : vector<2x128xf32>
      %c4 = arith.constant 4 : index
      %66 = memref.load %arg3[%c4] : memref<14xf32, #tpu.memory_space<smem>>
      %67 = vector.broadcast %66 : f32 to vector<2x128xf32>
      %68 = arith.mulf %17, %67 : vector<2x128xf32>
      %c11 = arith.constant 11 : index
      %69 = memref.load %arg3[%c11] : memref<14xf32, #tpu.memory_space<smem>>
      %70 = vector.broadcast %69 : f32 to vector<2x128xf32>
      %71 = arith.mulf %18, %70 : vector<2x128xf32>
      %72 = arith.addf %68, %71 : vector<2x128xf32>
      %c127_i32 = arith.constant 127 : i32
      %73 = tpu.dynamic_rotate %72 by %c127_i32 dim 1 : vector<2x128xf32>, i32 -> vector<2x128xf32>
      %c126_i32 = arith.constant 126 : i32
      %74 = vector.broadcast %c126_i32 : i32 to vector<2x128xi32>
      %75 = arith.cmpi sle, %19, %74 : vector<2x128xi32>
      %cst_26 = arith.constant 0.000000e+00 : f32
      %76 = vector.broadcast %cst_26 : f32 to vector<2x128xf32>
      %77 = arith.select %75, %73, %76 : vector<2x128xi1>, vector<2x128xf32>
      %78 = arith.addf %65, %77 : vector<2x128xf32>
      %c5 = arith.constant 5 : index
      %79 = memref.load %arg3[%c5] : memref<14xf32, #tpu.memory_space<smem>>
      %80 = vector.broadcast %79 : f32 to vector<2x128xf32>
      %81 = arith.mulf %17, %80 : vector<2x128xf32>
      %c12 = arith.constant 12 : index
      %82 = memref.load %arg3[%c12] : memref<14xf32, #tpu.memory_space<smem>>
      %83 = vector.broadcast %82 : f32 to vector<2x128xf32>
      %84 = arith.mulf %18, %83 : vector<2x128xf32>
      %85 = arith.addf %81, %84 : vector<2x128xf32>
      %c126_i32_27 = arith.constant 126 : i32
      %86 = tpu.dynamic_rotate %85 by %c126_i32_27 dim 1 : vector<2x128xf32>, i32 -> vector<2x128xf32>
      %c125_i32 = arith.constant 125 : i32
      %87 = vector.broadcast %c125_i32 : i32 to vector<2x128xi32>
      %88 = arith.cmpi sle, %19, %87 : vector<2x128xi32>
      %cst_28 = arith.constant 0.000000e+00 : f32
      %89 = vector.broadcast %cst_28 : f32 to vector<2x128xf32>
      %90 = arith.select %88, %86, %89 : vector<2x128xi1>, vector<2x128xf32>
      %91 = arith.addf %78, %90 : vector<2x128xf32>
      %c6 = arith.constant 6 : index
      %92 = memref.load %arg3[%c6] : memref<14xf32, #tpu.memory_space<smem>>
      %93 = vector.broadcast %92 : f32 to vector<2x128xf32>
      %94 = arith.mulf %17, %93 : vector<2x128xf32>
      %c13 = arith.constant 13 : index
      %95 = memref.load %arg3[%c13] : memref<14xf32, #tpu.memory_space<smem>>
      %96 = vector.broadcast %95 : f32 to vector<2x128xf32>
      %97 = arith.mulf %18, %96 : vector<2x128xf32>
      %98 = arith.addf %94, %97 : vector<2x128xf32>
      %c125_i32_29 = arith.constant 125 : i32
      %99 = tpu.dynamic_rotate %98 by %c125_i32_29 dim 1 : vector<2x128xf32>, i32 -> vector<2x128xf32>
      %c124_i32 = arith.constant 124 : i32
      %100 = vector.broadcast %c124_i32 : i32 to vector<2x128xi32>
      %101 = arith.cmpi sle, %19, %100 : vector<2x128xi32>
      %cst_30 = arith.constant 0.000000e+00 : f32
      %102 = vector.broadcast %cst_30 : f32 to vector<2x128xf32>
      %103 = arith.select %101, %99, %102 : vector<2x128xi1>, vector<2x128xf32>
      %104 = arith.addf %91, %103 : vector<2x128xf32>
      %105 = arith.negf %104 : vector<2x128xf32>
      %106 = math.exp %105 : vector<2x128xf32>
      %cst_31 = arith.constant 1.000000e+00 : f32
      %107 = vector.broadcast %cst_31 : f32 to vector<2x128xf32>
      %108 = arith.addf %107, %106 : vector<2x128xf32>
      %109 = arith.divf %107, %108 : vector<2x128xf32>
      %c0_32 = arith.constant 0 : index
      %c0_33 = arith.constant 0 : index
      %110 = vector.load %arg4[%c0_32, %c0_33] : memref<2x128xf32, #tpu.memory_space<vmem>>, vector<2x128xf32>
      tpu.vector_store %arg4[%c0_32, %c0_33], %109 {strides = array<i32>} : memref<2x128xf32, #tpu.memory_space<vmem>>, vector<2x128xf32>,
    } else {
    }
    return
  }
  func.func @transform_0(%arg0: i32, %arg1: i32) -> (i32, i32, i32) {
    %c0_i32 = arith.constant 0 : i32
    %c0_i32_0 = arith.constant 0 : i32
    return %arg0, %arg1, %c0_i32 : i32, i32, i32
  }
  func.func @transform_1(%arg0: i32, %arg1: i32) -> i32 {
    %c0_i32 = arith.constant 0 : i32
    %c0_i32_0 = arith.constant 0 : i32
    return %c0_i32 : i32
  }
  func.func @transform_2(%arg0: i32, %arg1: i32) -> (i32, i32) {
    %c0_i32 = arith.constant 0 : i32
    %c0_i32_0 = arith.constant 0 : i32
    return %arg0, %c0_i32 : i32, i32
  }
}

</mosaic_0001>

<bundles_post_ra>
// kernel: tpu_custom_call.1
= control target key start
LH: loop header
LB: loop body
LE: loop exit
PB: predicated region body
PF: predicated region fallthrough
CT: control target
= control target key end

     0   :  { %7 = vsyncpa [#allocation5], 0  ;;  %s383_s0 = inlined_call_operand.hbm [shape: f32[2,16,128], index: 0, kind: input, shape index: {}]   ;;  %s384_s1 = inlined_call_operand.vmem [shape: f32[14], index: 1, kind: input, shape index: {}]   ;;  %s385_s2 = inlined_call_operand.hbm [shape: f32[2,128], index: 2, kind: output, shape index: {}]  }
   0x1   :  { %8 = vsyncpa [#allocation7], 0 }
   0x2   :  { %9 = vsyncpa [#allocation6], 0  ;;  %s295_s9 = smov [#allocation4]   ;;  %s28_s13 = sshll.u32 %s384_s1, 4  ;;  %s29_s13 = int_to_ptr.vmem [resolvable:$true] %s28_s13 }
   0x3   :  { %s15_s10 = sshll.u32 %s295_s9, 4  ;;  %s233_s16 = scalar_lea.hbm %s383_s0, 512  ;;  %s16_s10 = int_to_ptr.vmem [resolvable:$true] %s15_s10 }
   0x4   :  { %p234_p0 = scmp.ne.s32.totalorder %s383_s0, %s233_s16  ;;  %p237_p1 = scmp.lt.u32.totalorder %s233_s16, %s383_s0 }
   0x6   :  { %p239_p2 = pnand %p237_p1, %p234_p0 }
   0x8   :  { %242 = shalt.err (!%p239_p2)
}
   0x9   :  { %s243_s21 = scalar_lea.vmem %s16_s10, 512  ;;  %p248_p4 = scmp.lt.s32.totalorder %s16_s10, %s16_s10 }
   0xa   :  { %p244_p3 = scmp.ne.s32.totalorder %s16_s10, %s243_s21  ;;  %p249_p5 = scmp.lt.s32.totalorder %s243_s21, %s243_s21 }
   0xc   :  { %p250_p6 = por %p249_p5, %p248_p4 }
   0xe   :  { %p251_p7 = pnand %p250_p6, %p244_p3 }
  0x10   :  { %254 = shalt.err (!%p251_p7)
}
  0x11   :  { %s296_s1 = smov 128   ;;  %s297_s22 = smov 8  }
  0x12   :  { %21 = dma.hbm_to_vmem [thread:$0]  %s383_s0, 512, %s16_s10, [#allocation5], %s296_s1, %s296_s1, %s297_s22  }
  0x13   :  { %s255_s25 = scalar_lea.vmem %s29_s13, 16  ;;  %p260_p9 = scmp.lt.s32.totalorder %s29_s13, %s29_s13 }
  0x14   :  { %p256_p8 = scmp.ne.s32.totalorder %s29_s13, %s255_s25  ;;  %p261_p10 = scmp.lt.s32.totalorder %s255_s25, %s255_s25 }
  0x16   :  { %p262_p11 = por %p261_p10, %p260_p9 }
  0x18   :  { %p263_p12 = pnand %p262_p11, %p256_p8 }
  0x1a   :  { %266 = shalt.err (!%p263_p12)
}
  0x1b   :  { %s298_s26 = smov [#allocation8]  }
  0x1c   :  { %31 = dma.vmem_to_smem %s29_s13, 16, %s298_s26, [#allocation7]  }
  0x1d   :  { %289 = dma.done.wait [#allocation5], 512  }
  0x1e   :  { %290 = vsyncadd [#allocation5], 4294966784 }
  0x1f   :  { %291 = dma.done.wait [#allocation7], 16  }
  0x20   :  { %292 = vsyncadd [#allocation7], 4294967280 }
  0x21   :  { %38 = sfence }
  0x22   :  { %v45_v0 = vld [vmem:[#allocation4] sm:$0xff]  ;;  %v46_v1 = vld [vmem:[#allocation4 + $0x8] sm:$0xff]  ;;  %v47_v2 = vld [vmem:[#allocation4 + $0x10] sm:$0xff]  ;;  %v299_v3 = vmov 0.0   ;;  %v300_v4 = vmov -inf   ;;  %vm66_vm0 = vcmask 1041409  }
  0x23   :  { %43 = vst [vmem:[#allocation2] sm:$0x3] %v299_v3  ;;  %44 = vst [vmem:[#allocation3] sm:$0x3] %v300_v4  ;;  %v48_v5 = vld [vmem:[#allocation4 + $0x18] sm:$0xff]  ;;  %v50_v6 = vadd.f32 %v46_v1, %v45_v0  ;;  %v72_v7 = vmax.f32 %v45_v0, %v46_v1  ;;  %s338_s0 = sld [smem:[#allocation8]] }
  0x24   :  { %v57_v8 = vadd.f32 %v48_v5, %v47_v2  ;;  %v79_v9 = vmax.f32 %v47_v2, %v48_v5  ;;  %s340_s27 = sld [smem:[#allocation8 + $0x7]]  ;;  %s342_s28 = sld [smem:[#allocation8 + $0x2]] }
  0x25   :  { %v51_v10 = vrot.slane %v50_v6, 4  ;;  %v73_v11 = vrot.slane %v72_v7, 4  ;;  %s344_s29 = sld [smem:[#allocation8 + $0x9]]  ;;  %s348_s3 = sld [smem:[#allocation8 + $0x8]] }
  0x26   :  { %v58_v12 = vrot.slane %v57_v8, 4  ;;  %v80_v13 = vrot.slane %v79_v9, 4  ;;  %s346_s30 = sld [smem:[#allocation8 + $0x1]]  ;;  %s350_s4 = sld [smem:[#allocation8 + $0x4]] }
  0x27   :  { %v52_v14 = vadd.f32 %v51_v10, %v50_v6  ;;  %v74_v15 = vmax.f32 %v72_v7, %v73_v11  ;;  %s210_s5 = sld [smem:[#allocation8 + $0xb]]  ;;  %s203_s6 = sld [smem:[#allocation8 + $0xa]] }
  0x28   :  { %v59_v16 = vadd.f32 %v58_v12, %v57_v8  ;;  %v81_v17 = vmax.f32 %v79_v9, %v80_v13  ;;  %s352_s7 = sld [smem:[#allocation8 + $0x5]]  ;;  %s354_s8 = sld [smem:[#allocation8 + $0xc]] }
  0x29   :  { %v53_v18 = vrot.slane %v52_v14, 2  ;;  %v75_v19 = vrot.slane %v74_v15, 2  ;;  %s202_s9 = sld [smem:[#allocation8 + $0x3]]  ;;  %s356_s10 = sld [smem:[#allocation8 + $0xd]]  ;;  %v108_v40 = vstv %s338_s0 }
  0x2a   :  { %v60_v20 = vrot.slane %v59_v16, 2  ;;  %v82_v21 = vrot.slane %v81_v17, 2  ;;  %v49_v32 = vld [vmem:[#allocation2] sm:$0x3]  ;;  %v71_v34 = vld [vmem:[#allocation3] sm:$0x3]  ;;  %v111_v41 = vstv %s340_s27  ;;  %v132_v43 = vstv %s342_s28 }
  0x2b   :  { %v54_v22 = vadd.f32 %v53_v18, %v52_v14  ;;  %v76_v23 = vmax.f32 %v74_v15, %v75_v19  ;;  %s358_s11 = sld [smem:[#allocation8 + $0x6]]  ;;  %v135_v42 = vstv %s344_s29  ;;  %v123_v44 = vstv %s348_s3  ;;  %s301_s12 = smov 3  }
  0x2c   :  { %v61_v24 = vadd.f32 %v60_v20, %v59_v16  ;;  %v83_v25 = vmax.f32 %v81_v17, %v82_v21  ;;  %v120_v49 = vstv %s346_s30  ;;  %v144_v50 = vstv %s350_s4  ;;  %s302_s13 = smov 1   ;;  %s303_s14 = smov 2  }
  0x2d   :  { %v55_v26 = vrot.slane %v54_v22, 1  ;;  %v77_v27 = vrot.slane %v76_v23, 1  ;;  %v147_v45 = vstv %s210_s5  ;;  %v104_v46 = vstv %s203_s6  ;;  %s304_s15 = smov 127   ;;  %s305_s16 = smov 126  }
  0x2e   :  { %v62_v28 = vrot.slane %v61_v24, 1  ;;  %v84_v29 = vrot.slane %v83_v25, 1  ;;  %v156_v51 = vstv %s352_s7  ;;  %v159_v52 = vstv %s354_s8  ;;  %s306_s17 = smov 125   ;;  %s307_s18 = smov [#allocation9]  }
  0x2f   :  { %v56_v30 = vadd.f32 %v55_v26, %v54_v22  ;;  %v78_v31 = vmax.f32 %v76_v23, %v77_v27  ;;  %v101_v56 = vstv %s202_s9  ;;  %v171_v59 = vstv %s356_s10  ;;  %s192_s19 = sshll.u32 %s307_s18, 4  ;;  %s193_s19 = int_to_ptr.vmem [resolvable:$true] %s192_s19 }
  0x30   :  { %v63_v33 = vadd.f32 %v62_v28, %v61_v24  ;;  %v85_v35 = vmax.f32 %v83_v25, %v84_v29  ;;  %v98_v14 = vlaneseq  ;;  %s267_s20 = scalar_lea.vmem %s193_s19, 32  ;;  %p272_p0 = scmp.lt.s32.totalorder %s193_s19, %s193_s19 }
  0x31   :  { %v168_v1 = vstv %s358_s11  ;;  %p268_p13 = scmp.ne.s32.totalorder %s193_s19, %s267_s20  ;;  %p273_p1 = scmp.lt.s32.totalorder %s267_s20, %s267_s20 }
  0x32   :  { %v67_v36 = vsel %vm66_vm0, %v63_v33, %v56_v30  ;;  %v88_v37 = vsel %vm66_vm0, %v85_v35, %v78_v31  ;;  %v99_v15 = vand.u32 127, %v98_v14 }
  0x33   :  { %v69_v38 = vadd.f32 %v67_v36, %v49_v32  ;;  %v90_v39 = vmax.f32 %v71_v34, %v88_v37  ;;  %p274_p2 = por %p273_p1, %p272_p0 }
  0x34   :  { %vm116_vm1 = vcmp.ge.s32.totalorder %v99_v15, 3  ;;  %vm128_vm2 = vcmp.ge.s32.totalorder %v99_v15, 2  ;;  %vm140_vm3 = vcmp.ge.s32.totalorder %v99_v15, 1  ;;  %vm152_vm4 = vcmp.le.s32.totalorder %v99_v15, 126 }
  0x35   :  { %70 = vst [vmem:[#allocation2] sm:$0x3] %v69_v38  ;;  %91 = vst [vmem:[#allocation3] sm:$0x3] %v90_v39  ;;  %vm164_vm5 = vcmp.le.s32.totalorder %v99_v15, 125  ;;  %vm176_vm6 = vcmp.le.s32.totalorder %v99_v15, 124  ;;  %p275_p3 = pnand %p274_p2, %p268_p13 }
  0x3c   :  { %v95_v47 = vld [vmem:[#allocation2] sm:$0x3]  ;;  %v97_v48 = vld [vmem:[#allocation3] sm:$0x3] }
  0x3d   :  { %v96_v53 = vmul.f32 0.0625, %v95_v47  ;;  %v112_v54 = vmul.f32 %v111_v41, %v97_v48  ;;  %v136_v55 = vmul.f32 %v135_v42, %v97_v48  ;;  %v124_v57 = vmul.f32 %v123_v44, %v97_v48 }
  0x3e   :  { %v148_v58 = vmul.f32 %v147_v45, %v97_v48  ;;  %v105_v60 = vmul.f32 %v104_v46, %v97_v48  ;;  %v160_v6 = vmul.f32 %v159_v52, %v97_v48  ;;  %v172_v7 = vmul.f32 %v171_v59, %v97_v48 }
  0x3f   :  { %v109_v61 = vmul.f32 %v108_v40, %v96_v53  ;;  %v133_v62 = vmul.f32 %v132_v43, %v96_v53  ;;  %v121_v63 = vmul.f32 %v120_v49, %v96_v53  ;;  %v145_v0 = vmul.f32 %v144_v50, %v96_v53 }
  0x40   :  { %v102_v2 = vmul.f32 %v101_v56, %v96_v53  ;;  %v157_v5 = vmul.f32 %v156_v51, %v96_v53  ;;  %v169_v11 = vmul.f32 %v168_v1, %v96_v53 }
  0x41   :  { %v113_v3 = vadd.f32 %v112_v54, %v109_v61  ;;  %v137_v4 = vadd.f32 %v136_v55, %v133_v62  ;;  %v125_v9 = vadd.f32 %v124_v57, %v121_v63  ;;  %v149_v10 = vadd.f32 %v148_v58, %v145_v0 }
  0x42   :  { %v106_v8 = vadd.f32 %v105_v60, %v102_v2  ;;  %v161_v12 = vadd.f32 %v160_v6, %v157_v5  ;;  %v173_v13 = vadd.f32 %v172_v7, %v169_v11 }
  0x43   :  { %114 = vrot.lane.b32.xlu0 %v113_v3, %s301_s12  ;;  %138 = vrot.lane.b32.xlu1 %v137_v4, %s302_s13 }
  0x47   :  { %126 = vrot.lane.b32.xlu0 %v125_v9, %s303_s14  ;;  %150 = vrot.lane.b32.xlu1 %v149_v10, %s304_s15 }
  0x4b   :  { %162 = vrot.lane.b32.xlu0 %v161_v12, %s305_s16  ;;  %174 = vrot.lane.b32.xlu1 %v173_v13, %s306_s17 }
  0xb5   :  { %v115_v16 = vpop.permute.xlu0 %114  ;;  %v139_v17 = vpop.permute.xlu1 %138 }
  0xb6   :  { %v117_v18 = vsel %vm116_vm1, %v115_v16, 0.0  ;;  %v141_v24 = vsel %vm140_vm3, %v139_v17, 0.0 }
  0xb7   :  { %v118_v19 = vadd.f32 %v117_v18, %v106_v8 }
  0xb9   :  { %v127_v20 = vpop.permute.xlu0 %126  ;;  %v151_v21 = vpop.permute.xlu1 %150 }
  0xba   :  { %v129_v22 = vsel %vm128_vm2, %v127_v20, 0.0  ;;  %v153_v25 = vsel %vm152_vm4, %v151_v21, 0.0 }
  0xbb   :  { %v130_v23 = vadd.f32 %v129_v22, %v118_v19 }
  0xbd   :  { %v142_v26 = vadd.f32 %v141_v24, %v130_v23  ;;  %v163_v27 = vpop.permute.xlu0 %162  ;;  %v175_v28 = vpop.permute.xlu1 %174 }
  0xbe   :  { %v165_v29 = vsel %vm164_vm5, %v163_v27, 0.0  ;;  %v177_v31 = vsel %vm176_vm6, %v175_v28, 0.0 }
  0xbf   :  { %v154_v30 = vadd.f32 %v153_v25, %v142_v26 }
  0xc1   :  { %v166_v32 = vadd.f32 %v165_v29, %v154_v30 }
  0xc3   :  { %v178_v33 = vadd.f32 %v177_v31, %v166_v32 }
  0xc5   :  { %v215_v34 = vmul.f32 -1.442695, %v178_v33 }
  0xc7   :  { %229 = vpow2.f32 %v215_v34 }
  0xd1   :  { %v230_v35 = vpop.eup %229 }
  0xd2   :  { %v182_v36 = vadd.f32 1.0, %v230_v35 }
  0xd4   :  { %231 = vrcp.f32 %v182_v36 }
  0xde   :  { %v232_v37 = vpop.eup %231 }
  0xdf   :  { %185 = vst [vmem:[#allocation9] sm:$0x3] %v232_v37 }
  0xe0   :  { %278 = shalt.err (!%p275_p3)
}
  0xe1   :  { %s279_s22 = scalar_lea.hbm %s385_s2, 32 }
  0xe2   :  { %p280_p4 = scmp.ne.s32.totalorder %s385_s2, %s279_s22  ;;  %p283_p5 = scmp.lt.u32.totalorder %s279_s22, %s385_s2 }
  0xe4   :  { %p285_p6 = pnand %p283_p5, %p280_p4 }
  0xe6   :  { %288 = shalt.err (!%p285_p6)
}
  0xe7   :  { %195 = dma.vmem_to_hbm [thread:$0]  %s193_s19, 32, %s385_s2, [#allocation6]  }
  0xe8   :  { %293 = dma.done.wait [#allocation6], 32  }
  0xe9   :  { %294 = vsyncadd [#allocation6], 4294967264 }
  0xea   :  { %199 = vsyncpa [#allocation5], 1 }
  0xeb   :  { %200 = vsyncpa [#allocation6], 1 }
  0xec   :  { %201 = vsyncpa [#allocation7], 1 }

</bundles_post_ra>
